<compile_context>
chip_gen: v7x
topology: tpu7x:2x2x1
jax: 0.10.0
libtpu: 0.0.40
codegen_flags: <defaults>
</compile_context>

<pallas_src>
import functools
import math

import jax
import jax.numpy as jnp
from jax.experimental import pallas as pl
from jax.experimental.pallas import tpu as pltpu


def _round_up(x, m):
    return ((x + m - 1) // m) * m


def _pick_row_tile(n, target):
    """Tile for a sublane (second-to-last) dim: multiple of 8 dividing round_up(n, 8)."""
    npad = _round_up(n, 8)
    t = min(_round_up(target, 8), npad)
    while npad % t:
        t -= 8
    return t, npad


def _pick_lane_tile(n, target):
    """Tile for a lane (last) dim: a 128-multiple dividing n, or the full (unpadded)
    extent when n is not a multiple of 128 (block == array dim is legal).  Avoids
    padding feature dims entirely."""
    if n % 128 == 0:
        t = min(_round_up(target, 128), n)
        while n % t:
            t -= 128
        return t, n
    return n, n


def _pad2d(a, rows, cols):
    pr, pc = rows - a.shape[0], cols - a.shape[1]
    if pr or pc:
        a = jnp.pad(a, ((0, pr), (0, pc)))
    return a


# ---------------------------------------------------------------------------
# Tiled Linear (x @ W + b) kernel — bf16 MXU operands, f32 accumulator
# ---------------------------------------------------------------------------
def _linear_bias_kernel(x_ref, w_ref, b_ref, o_ref, acc_ref):
    k = pl.program_id(2)

    @pl.when(k == 0)
    def _():
        acc_ref[...] = jnp.zeros_like(acc_ref)

    acc_ref[...] += jnp.dot(x_ref[...].astype(jnp.bfloat16),
                            w_ref[...].astype(jnp.bfloat16),
                            preferred_element_type=jnp.float32)

    @pl.when(k == pl.num_programs(2) - 1)
    def _():
        # Bias added once in the finalize branch (not per K step).
        o_ref[...] = (acc_ref[...] + b_ref[...]).astype(o_ref.dtype)


def pallas_linear(x, w, b, *, tm=256, tn=512, tk=512):
    """x: (M, K), w: (K, N), b: (N,) -> (M, N)."""
    M, K = x.shape
    N = w.shape[1]

    TM, Mp = _pick_row_tile(M, tm)
    TN, Np = _pick_lane_tile(N, tn)
    TK, Kp = _pick_lane_tile(K, tk)

    xp = _pad2d(x, Mp, Kp)
    wp = _pad2d(w, Kp, Np)
    bp = _pad2d(b.reshape(1, N), 1, Np)

    grid = (Mp // TM, Np // TN, Kp // TK)
    out = pl.pallas_call(
        _linear_bias_kernel,
        out_shape=jax.ShapeDtypeStruct((Mp, Np), x.dtype),
        grid_spec=pltpu.PrefetchScalarGridSpec(
            num_scalar_prefetch=0,
            grid=grid,
            in_specs=[
                pl.BlockSpec((TM, TK), lambda i, j, k: (i, k)),
                pl.BlockSpec((TK, TN), lambda i, j, k: (k, j)),
                pl.BlockSpec((1, TN), lambda i, j, k: (0, j)),
            ],
            out_specs=pl.BlockSpec((TM, TN), lambda i, j, k: (i, j)),
            scratch_shapes=[pltpu.VMEM((TM, TN), jnp.float32)],
        ),
        compiler_params=pltpu.CompilerParams(
            dimension_semantics=("parallel", "parallel", "arbitrary"),
            vmem_limit_bytes=32 * 1024 * 1024,
        ),
        cost_estimate=pl.CostEstimate(
            flops=2 * Mp * Np * Kp,
            transcendentals=0,
            # include operand re-reads across the i/j grid
            bytes_accessed=4 * (Mp * Kp * grid[1] + Kp * Np * grid[0] + Mp * Np),
        ),
    )(xp, wp, bp)
    return out[:M, :N]


# ---------------------------------------------------------------------------
# Flash-attention kernel — unpadded head dims, online softmax, f32 scratch
# ---------------------------------------------------------------------------
def _flash_attn_kernel(q_ref, k_ref, v_ref, o_ref, m_sc, l_sc, acc_sc,
                       *, scale, nk_valid, nk_padded, tkv):
    kv = pl.program_id(2)

    @pl.when(kv == 0)
    def _():
        m_sc[...] = jnp.full(m_sc.shape, -jnp.inf, jnp.float32)
        l_sc[...] = jnp.zeros(l_sc.shape, jnp.float32)
        acc_sc[...] = jnp.zeros(acc_sc.shape, jnp.float32)

    # Fold 1/sqrt(d_k) into q once per tile instead of scaling s every kv step.
    q = (q_ref[0] * scale).astype(jnp.bfloat16)            # (TQ, d_k)
    k = k_ref[0].astype(jnp.bfloat16)                      # (TKV, d_k)
    s = jax.lax.dot_general(q, k, (((1,), (1,)), ((), ())),
                            preferred_element_type=jnp.float32)   # (TQ, TKV)

    if nk_padded != nk_valid:
        # Only compiled when nk % 8 != 0.  TKV divides round_up(nk, 8), so padding
        # lives solely in the last kv block and that block holds >= 1 valid key
        # (m stays finite, no -inf - -inf NaN).
        kv_idx = kv * tkv + jax.lax.broadcasted_iota(jnp.int32, s.shape, 1)
        s = jnp.where(kv_idx < nk_valid, s, -jnp.inf)

    m_prev = m_sc[...]
    m_new = jnp.maximum(m_prev, s.max(axis=-1, keepdims=True))
    alpha = jnp.exp(m_prev - m_new)
    p = jnp.exp(s - m_new)
    l_sc[...] = alpha * l_sc[...] + p.sum(axis=-1, keepdims=True)
    acc_sc[...] = alpha * acc_sc[...] + jnp.dot(
        p.astype(jnp.bfloat16), v_ref[0].astype(jnp.bfloat16),
        preferred_element_type=jnp.float32)
    m_sc[...] = m_new

    @pl.when(kv == pl.num_programs(2) - 1)
    def _():
        inv_l = pl.reciprocal(l_sc[...], approx=True)      # EUP, not VPU divide
        o_ref[0] = (acc_sc[...] * inv_l).astype(o_ref.dtype)


def pallas_attention(q, k, v, scale, *, tq=512, tkv=1024):
    """q: (BH, nq, d_k), k: (BH, nk, d_k), v: (BH, nk, d_v) -> (BH, nq, d_v)."""
    BH, nq, dk = q.shape
    nk = k.shape[1]
    dv = v.shape[2]

    TQ, nqp = _pick_row_tile(nq, tq)
    TKV, nkp = _pick_row_tile(nk, tkv)

    qp = jnp.pad(q, ((0, 0), (0, nqp - nq), (0, 0))) if nqp != nq else q
    kp = jnp.pad(k, ((0, 0), (0, nkp - nk), (0, 0))) if nkp != nk else k
    vp = jnp.pad(v, ((0, 0), (0, nkp - nk), (0, 0))) if nkp != nk else v

    kernel = functools.partial(_flash_attn_kernel, scale=scale,
                               nk_valid=nk, nk_padded=nkp, tkv=TKV)

    grid = (BH, nqp // TQ, nkp // TKV)
    out = pl.pallas_call(
        kernel,
        out_shape=jax.ShapeDtypeStruct((BH, nqp, dv), q.dtype),
        grid_spec=pltpu.PrefetchScalarGridSpec(
            num_scalar_prefetch=0,
            grid=grid,
            in_specs=[
                pl.BlockSpec((1, TQ, dk), lambda b, qi, ki: (b, qi, 0)),
                pl.BlockSpec((1, TKV, dk), lambda b, qi, ki: (b, ki, 0)),
                pl.BlockSpec((1, TKV, dv), lambda b, qi, ki: (b, ki, 0)),
            ],
            out_specs=pl.BlockSpec((1, TQ, dv), lambda b, qi, ki: (b, qi, 0)),
            scratch_shapes=[
                pltpu.VMEM((TQ, 1), jnp.float32),     # running max m
                pltpu.VMEM((TQ, 1), jnp.float32),     # running sum l
                pltpu.VMEM((TQ, dv), jnp.float32),    # f32 accumulator
            ],
        ),
        compiler_params=pltpu.CompilerParams(
            dimension_semantics=("parallel", "parallel", "arbitrary"),
            vmem_limit_bytes=32 * 1024 * 1024,
        ),
        cost_estimate=pl.CostEstimate(
            flops=2 * BH * nqp * nkp * (dk + dv),
            transcendentals=BH * nqp * nkp,
            bytes_accessed=4 * BH * (nqp * dk + (nqp // TQ) * nkp * (dk + dv)
                                     + nqp * dv),
        ),
    )(qp, kp, vp)
    return out[:, :nq, :]


# ---------------------------------------------------------------------------
# Fused output projection + residual add + LayerNorm kernel
#   layer_norm(residual + (x @ w + b))
# ---------------------------------------------------------------------------
def _outproj_residual_ln_kernel(x_ref, w_ref, b_ref, r_ref, g_ref, bt_ref, o_ref,
                                acc_ref, *, eps):
    k = pl.program_id(1)

    @pl.when(k == 0)
    def _():
        acc_ref[...] = jnp.zeros_like(acc_ref)

    acc_ref[...] += jnp.dot(x_ref[...].astype(jnp.bfloat16),
                            w_ref[...].astype(jnp.bfloat16),
                            preferred_element_type=jnp.float32)

    @pl.when(k == pl.num_programs(1) - 1)
    def _():
        z = acc_ref[...] + b_ref[...] + r_ref[...].astype(jnp.float32)
        mean = jnp.mean(z, axis=-1, keepdims=True)
        cen = z - mean
        var = jnp.mean(cen * cen, axis=-1, keepdims=True)
        zn = cen * jax.lax.rsqrt(var + eps)
        o_ref[...] = (zn * g_ref[...] + bt_ref[...]).astype(o_ref.dtype)


def pallas_outproj_residual_layernorm(x, w, b, residual, gamma, beta,
                                      *, eps=1e-5, tm=256, tk=512):
    """x: (M, K), w: (K, D), residual: (M, D) -> layer_norm(residual + x@w + b).
    D (= d_model) is a single full-extent block so the whole LN row is resident."""
    M, K = x.shape
    D = w.shape[1]

    TM, Mp = _pick_row_tile(M, tm)
    TK, Kp = _pick_lane_tile(K, tk)

    xp = _pad2d(x, Mp, Kp)
    wp = _pad2d(w, Kp, D)
    rp = _pad2d(residual, Mp, D)

    grid = (Mp // TM, Kp // TK)
    out = pl.pallas_call(
        functools.partial(_outproj_residual_ln_kernel, eps=eps),
        out_shape=jax.ShapeDtypeStruct((Mp, D), x.dtype),
        grid_spec=pltpu.PrefetchScalarGridSpec(
            num_scalar_prefetch=0,
            grid=grid,
            in_specs=[
                pl.BlockSpec((TM, TK), lambda i, k: (i, k)),
                pl.BlockSpec((TK, D), lambda i, k: (k, 0)),
                pl.BlockSpec((1, D), lambda i, k: (0, 0)),
                pl.BlockSpec((TM, D), lambda i, k: (i, 0)),
                pl.BlockSpec((1, D), lambda i, k: (0, 0)),
                pl.BlockSpec((1, D), lambda i, k: (0, 0)),
            ],
            out_specs=pl.BlockSpec((TM, D), lambda i, k: (i, 0)),
            scratch_shapes=[pltpu.VMEM((TM, D), jnp.float32)],
        ),
        compiler_params=pltpu.CompilerParams(
            dimension_semantics=("parallel", "arbitrary"),
            vmem_limit_bytes=32 * 1024 * 1024,
        ),
        cost_estimate=pl.CostEstimate(
            flops=2 * Mp * D * Kp + 10 * Mp * D,
            transcendentals=Mp,
            bytes_accessed=4 * (Mp * Kp + Kp * D * grid[0] + 3 * Mp * D),
        ),
    )(xp, wp, b.reshape(1, D), rp, gamma.reshape(1, D), beta.reshape(1, D))
    return out[:M]


# ---------------------------------------------------------------------------
# Full MultiHeadAttention forward (default path: no stateful cache, no mask)
# ---------------------------------------------------------------------------
def multi_head_attention_forward(queries, keys, values, params, d_k, d_v, h):
    b_s, nq, d_model = queries.shape
    nk = keys.shape[1]

    q = pallas_linear(queries.reshape(b_s * nq, d_model), params["wq"], params["bq"])
    k = pallas_linear(keys.reshape(b_s * nk, d_model), params["wk"], params["bk"])
    v = pallas_linear(values.reshape(b_s * nk, d_model), params["wv"], params["bv"])

    # Head-major layout for the attention kernel (no padding of the head dims).
    q = q.reshape(b_s, nq, h, d_k).transpose(0, 2, 1, 3).reshape(b_s * h, nq, d_k)
    k = k.reshape(b_s, nk, h, d_k).transpose(0, 2, 1, 3).reshape(b_s * h, nk, d_k)
    v = v.reshape(b_s, nk, h, d_v).transpose(0, 2, 1, 3).reshape(b_s * h, nk, d_v)

    attn = pallas_attention(q, k, v, scale=1.0 / math.sqrt(d_k))   # (b*h, nq, d_v)

    attn = attn.reshape(b_s, h, nq, d_v).transpose(0, 2, 1, 3).reshape(b_s * nq, h * d_v)

    # Dropout = identity (inference); fc_o + residual + LayerNorm fused in one kernel.
    out = pallas_outproj_residual_layernorm(
        attn, params["wo"], params["bo"],
        queries.reshape(b_s * nq, d_model), params["ln_g"], params["ln_b"])
    return out.reshape(b_s, nq, d_model)


# ---------------------------------------------------------------------------
# Parameter init (matches init_weights: xavier_uniform weights, zero biases)
# ---------------------------------------------------------------------------
def _xavier_uniform(key, shape, dtype=jnp.float32):
    fan_in, fan_out = shape
    a = math.sqrt(6.0 / (fan_in + fan_out))
    return jax.random.uniform(key, shape, dtype, minval=-a, maxval=a)


def init_params(key, d_model, d_k, d_v, h):
    ks = jax.random.split(key, 4)
    return dict(
        wq=_xavier_uniform(ks[0], (d_model, h * d_k)),
        bq=jnp.zeros((h * d_k,), jnp.float32),
        wk=_xavier_uniform(ks[1], (d_model, h * d_k)),
        bk=jnp.zeros((h * d_k,), jnp.float32),
        wv=_xavier_uniform(ks[2], (d_model, h * d_v)),
        bv=jnp.zeros((h * d_v,), jnp.float32),
        wo=_xavier_uniform(ks[3], (h * d_v, d_model)),
        bo=jnp.zeros((d_model,), jnp.float32),
        ln_g=jnp.ones((d_model,), jnp.float32),
        ln_b=jnp.zeros((d_model,), jnp.float32),
    )


# Pure-JAX (f32) reference of the same forward pass.
def ref_forward(queries, keys, values, params, d_k, d_v, h, eps=1e-5):
    b_s, nq, d_model = queries.shape
    nk = keys.shape[1]
    q = (queries @ params["wq"] + params["bq"]).reshape(b_s, nq, h, d_k).transpose(0, 2, 1, 3)
    k = (keys @ params["wk"] + params["bk"]).reshape(b_s, nk, h, d_k).transpose(0, 2, 3, 1)
    v = (values @ params["wv"] + params["bv"]).reshape(b_s, nk, h, d_v).transpose(0, 2, 1, 3)
    att = jnp.matmul(q, k) / math.sqrt(d_k)
    att = jax.nn.softmax(att, axis=-1)
    out = jnp.matmul(att, v).transpose(0, 2, 1, 3).reshape(b_s, nq, h * d_v)
    out = out @ params["wo"] + params["bo"]
    res = queries + out
    mean = res.mean(-1, keepdims=True)
    var = ((res - mean) ** 2).mean(-1, keepdims=True)
    return (res - mean) / jnp.sqrt(var + eps) * params["ln_g"] + params["ln_b"]


if __name__ == "__main__":
    key = jax.random.PRNGKey(0)
    k_q, k_k, k_v, k_p = jax.random.split(key, 4)

    B, NQ, NK = 2, 8, 8
    D_MODEL, D_K, D_V, H = 32, 8, 8, 4

    queries = jax.random.normal(k_q, (B, NQ, D_MODEL), dtype=jnp.float32)
    keys_in = jax.random.normal(k_k, (B, NK, D_MODEL), dtype=jnp.float32)
    values = jax.random.normal(k_v, (B, NK, D_MODEL), dtype=jnp.float32)

    params = init_params(k_p, D_MODEL, D_K, D_V, H)

    out = multi_head_attention_forward(queries, keys_in, values, params, D_K, D_V, H)
    out = jax.block_until_ready(out)

    ref = ref_forward(queries, keys_in, values, params, D_K, D_V, H)
    assert out.shape == (B, NQ, D_MODEL)
    max_diff = float(jnp.max(jnp.abs(out - ref)))
    # bf16 MXU operands (f32 accumulation) vs. f32 reference -> slightly looser tolerance.
    assert jnp.allclose(out, ref, atol=3e-2, rtol=3e-2), max_diff

    print("KERNEL_OK")
</pallas_src>

<mosaic_0001>
module attributes {stable_mosaic.version = 11 : i64} {
  func.func @_linear_bias_kernel(%arg0: i32, %arg1: i32, %arg2: i32, %arg3: memref<16x32xf32, #tpu.memory_space<vmem>>, %arg4: memref<32x32xf32, #tpu.memory_space<vmem>>, %arg5: memref<1x32xf32, #tpu.memory_space<vmem>>, %arg6: memref<16x32xf32, #tpu.memory_space<vmem>>, %arg7: memref<16x32xf32, #tpu.memory_space<vmem>>) attributes {dimension_semantics = [#tpu.dimension_semantics<parallel>, #tpu.dimension_semantics<parallel>, #tpu.dimension_semantics<arbitrary>], iteration_bounds = array<i64: 1, 1, 1>, scalar_prefetch = 0 : i64, scratch_operands = 1 : i64, tpu.core_type = #tpu.core_type<tc>, window_params = [{transform_indices = @transform_0, window_bounds = array<i64: 16, 32>}, {transform_indices = @transform_1, window_bounds = array<i64: 32, 32>}, {transform_indices = @transform_2, window_bounds = array<i64: 1, 32>}, {transform_indices = @transform_3, window_bounds = array<i64: 16, 32>}]} {
    %c0_i32 = arith.constant 0 : i32
    %0 = arith.cmpi eq, %arg2, %c0_i32 : i32
    %1 = arith.extui %0 : i1 to i32
    %c0_i32_0 = arith.constant 0 : i32
    %2 = arith.cmpi ne, %1, %c0_i32_0 : i32
    scf.if %2 {
      %cst_10 = arith.constant 0.000000e+00 : f32
      %14 = vector.broadcast %cst_10 : f32 to vector<16x32xf32>
      %c0_11 = arith.constant 0 : index
      %c0_12 = arith.constant 0 : index
      %15 = vector.load %arg7[%c0_11, %c0_12] : memref<16x32xf32, #tpu.memory_space<vmem>>, vector<16x32xf32>
      tpu.vector_store %arg7[%c0_11, %c0_12], %14 {strides = array<i32>} : memref<16x32xf32, #tpu.memory_space<vmem>>, vector<16x32xf32>,
    } else {
    }
    %c0 = arith.constant 0 : index
    %c0_1 = arith.constant 0 : index
    %3 = vector.load %arg7[%c0, %c0_1] : memref<16x32xf32, #tpu.memory_space<vmem>>, vector<16x32xf32>
    %c0_2 = arith.constant 0 : index
    %c0_3 = arith.constant 0 : index
    %4 = vector.load %arg3[%c0_2, %c0_3] : memref<16x32xf32, #tpu.memory_space<vmem>>, vector<16x32xf32>
    %5 = arith.truncf %4 : vector<16x32xf32> to vector<16x32xbf16>
    %c0_4 = arith.constant 0 : index
    %c0_5 = arith.constant 0 : index
    %6 = vector.load %arg4[%c0_4, %c0_5] : memref<32x32xf32, #tpu.memory_space<vmem>>, vector<32x32xf32>
    %7 = arith.truncf %6 : vector<32x32xf32> to vector<32x32xbf16>
    %cst = arith.constant dense<0.000000e+00> : vector<16x32xf32>
    %8 = tpu.matmul %5, %7, %cst {dimension_numbers = #tpu.dot_dimension_numbers<[1], [0], [0], [1], [0, 0, 1, 1], [], []>} : vector<16x32xbf16>, vector<32x32xbf16>, vector<16x32xf32> -> vector<16x32xf32>
    %9 = arith.addf %3, %8 : vector<16x32xf32>
    %c0_6 = arith.constant 0 : index
    %c0_7 = arith.constant 0 : index
    %10 = vector.load %arg7[%c0_6, %c0_7] : memref<16x32xf32, #tpu.memory_space<vmem>>, vector<16x32xf32>
    tpu.vector_store %arg7[%c0_6, %c0_7], %9 {strides = array<i32>} : memref<16x32xf32, #tpu.memory_space<vmem>>, vector<16x32xf32>,
    %c0_i32_8 = arith.constant 0 : i32
    %11 = arith.cmpi eq, %arg2, %c0_i32_8 : i32
    %12 = arith.extui %11 : i1 to i32
    %c0_i32_9 = arith.constant 0 : i32
    %13 = arith.cmpi ne, %12, %c0_i32_9 : i32
    scf.if %13 {
      %c0_10 = arith.constant 0 : index
      %c0_11 = arith.constant 0 : index
      %14 = vector.load %arg7[%c0_10, %c0_11] : memref<16x32xf32, #tpu.memory_space<vmem>>, vector<16x32xf32>
      %c0_12 = arith.constant 0 : index
      %c0_13 = arith.constant 0 : index
      %15 = vector.load %arg5[%c0_12, %c0_13] : memref<1x32xf32, #tpu.memory_space<vmem>>, vector<1x32xf32>
      %16 = vector.broadcast %15 : vector<1x32xf32> to vector<16x32xf32>
      %17 = arith.addf %14, %16 : vector<16x32xf32>
      %c0_14 = arith.constant 0 : index
      %c0_15 = arith.constant 0 : index
      %18 = vector.load %arg6[%c0_14, %c0_15] : memref<16x32xf32, #tpu.memory_space<vmem>>, vector<16x32xf32>
      tpu.vector_store %arg6[%c0_14, %c0_15], %17 {strides = array<i32>} : memref<16x32xf32, #tpu.memory_space<vmem>>, vector<16x32xf32>,
    } else {
    }
    return
  }
  func.func @transform_0(%arg0: i32, %arg1: i32, %arg2: i32) -> (i32, i32) {
    %c0_i32 = arith.constant 0 : i32
    return %arg0, %arg2 : i32, i32
  }
  func.func @transform_1(%arg0: i32, %arg1: i32, %arg2: i32) -> (i32, i32) {
    %c0_i32 = arith.constant 0 : i32
    return %arg2, %arg1 : i32, i32
  }
  func.func @transform_2(%arg0: i32, %arg1: i32, %arg2: i32) -> (i32, i32) {
    %c0_i32 = arith.constant 0 : i32
    %c0_i32_0 = arith.constant 0 : i32
    return %c0_i32, %arg1 : i32, i32
  }
  func.func @transform_3(%arg0: i32, %arg1: i32, %arg2: i32) -> (i32, i32) {
    %c0_i32 = arith.constant 0 : i32
    return %arg0, %arg1 : i32, i32
  }
}

</mosaic_0001>

<bundles_post_ra>
// kernel: tpu_custom_call.1
= control target key start
LH: loop header
LB: loop body
LE: loop exit
PB: predicated region body
PF: predicated region fallthrough
CT: control target
= control target key end

     0   :  { %8 = vsyncpa [#allocation4], 0  ;;  %s319_s0 = inlined_call_operand.hbm [shape: f32[16,32], index: 0, kind: input, shape index: {}]   ;;  %s320_s1 = inlined_call_operand.hbm [shape: f32[32,32], index: 1, kind: input, shape index: {}]   ;;  %s321_s2 = inlined_call_operand.vmem [shape: f32[1,32], index: 2, kind: input, shape index: {}]   ;;  %s322_s3 = inlined_call_operand.hbm [shape: f32[16,32], index: 3, kind: output, shape index: {}]  }
   0x1   :  { %9 = vsyncpa [#allocation7], 0 }
   0x2   :  { %10 = vsyncpa [#allocation5], 0  ;;  %s237_s12 = smov [#allocation3]   ;;  %s165_s16 = scalar_lea.hbm %s319_s0, 256 }
   0x3   :  { %s16_s13 = sshll.u32 %s237_s12, 4  ;;  %p166_p0 = scmp.ne.s32.totalorder %s319_s0, %s165_s16  ;;  %s17_s13 = int_to_ptr.vmem [resolvable:$true] %s16_s13 }
   0x4   :  { %p169_p1 = scmp.lt.u32.totalorder %s165_s16, %s319_s0 }
   0x6   :  { %p171_p2 = pnand %p169_p1, %p166_p0 }
   0x8   :  { %174 = shalt.err (!%p171_p2)
}
   0x9   :  { %s175_s21 = scalar_lea.vmem %s17_s13, 256  ;;  %p180_p4 = scmp.lt.s32.totalorder %s17_s13, %s17_s13 }
   0xa   :  { %p176_p3 = scmp.ne.s32.totalorder %s17_s13, %s175_s21  ;;  %p181_p5 = scmp.lt.s32.totalorder %s175_s21, %s175_s21 }
   0xc   :  { %p182_p6 = por %p181_p5, %p180_p4 }
   0xe   :  { %p183_p7 = pnand %p182_p6, %p176_p3 }
  0x10   :  { %186 = shalt.err (!%p183_p7)
}
  0x11   :  { %s238_s22 = smov 128   ;;  %s239_s23 = smov 8  }
  0x12   :  { %22 = dma.hbm_to_vmem [thread:$0]  %s319_s0, 256, %s17_s13, [#allocation4], %s238_s22, %s238_s22, %s239_s23  }
  0x13   :  { %s240_s26 = smov [#allocation6]   ;;  %s187_s30 = scalar_lea.hbm %s320_s1, 512 }
  0x14   :  { %s28_s27 = sshll.u32 %s240_s26, 4  ;;  %p188_p8 = scmp.ne.s32.totalorder %s320_s1, %s187_s30  ;;  %s29_s27 = int_to_ptr.vmem [resolvable:$true] %s28_s27 }
  0x15   :  { %p191_p9 = scmp.lt.u32.totalorder %s187_s30, %s320_s1 }
  0x17   :  { %p193_p10 = pnand %p191_p9, %p188_p8 }
  0x19   :  { %196 = shalt.err (!%p193_p10)
}
  0x1a   :  { %s197_s8 = scalar_lea.vmem %s29_s27, 512  ;;  %p202_p12 = scmp.lt.s32.totalorder %s29_s27, %s29_s27 }
  0x1b   :  { %p198_p11 = scmp.ne.s32.totalorder %s29_s27, %s197_s8  ;;  %p203_p13 = scmp.lt.s32.totalorder %s197_s8, %s197_s8 }
  0x1d   :  { %p204_p0 = por %p203_p13, %p202_p12 }
  0x1f   :  { %p205_p1 = pnand %p204_p0, %p198_p11 }
  0x21   :  { %208 = shalt.err (!%p205_p1)
}
  0x22   :  { %34 = dma.hbm_to_vmem [thread:$0]  %s320_s1, 512, %s29_s27, [#allocation7], %s238_s22, %s238_s22, %s239_s23  }
  0x23   :  { %231 = dma.done.wait [#allocation4], 256  }
  0x24   :  { %232 = vsyncadd [#allocation4], 4294967040 }
  0x25   :  { %233 = dma.done.wait [#allocation7], 512  }
  0x26   :  { %234 = vsyncadd [#allocation7], 4294966784  ;;  %vm48_vm0 = vcmask 261120   ;;  %v241_v0 = vmov 0.0   ;;  %vm242_vm1 = vmmov 0   ;;  %v56_v1 = vld [vmem:[#allocation6] sm:$0xff] }
  0x27   :  { %150 = vmatprep.subr.bf16.mxu0 %v241_v0  ;;  %154 = vmatprep.mubr.msk.bf16.mxu0 %vm242_vm1, %v241_v0  ;;  %49 = vst.msk [vmem:[#allocation2] sm:$0xff] %vm48_vm0, %v241_v0  ;;  %50 = vst.msk [vmem:[#allocation2 + $0x8] sm:$0xff] %vm48_vm0, %v241_v0  ;;  %v57_v2 = vld [vmem:[#allocation6 + $0x8] sm:$0xff]  ;;  %v58_v3 = vld [vmem:[#allocation6 + $0x10] sm:$0xff]  ;;  %s243_s11 = smov [#allocation8]  }
  0x28   :  { %v60_v4 = vpack.c.bf16 %v57_v2, %v56_v1  ;;  %v59_v5 = vld [vmem:[#allocation6 + $0x18] sm:$0xff]  ;;  %v53_v7 = vld [vmem:[#allocation3] sm:$0xff]  ;;  %v146_v18 = vld [vmem:[%s321_s2] ss:$0 sm:$0xff]  ;;  %s132_s12 = sshll.u32 %s243_s11, 4  ;;  %s133_s12 = int_to_ptr.vmem [resolvable:$true] %s132_s12 }
  0x29   :  { %v61_v6 = vpack.c.bf16 %v59_v5, %v58_v3  ;;  %v54_v8 = vld [vmem:[#allocation3 + $0x8] sm:$0xff]  ;;  %s209_s13 = scalar_lea.vmem %s133_s12, 256  ;;  %p214_p3 = scmp.lt.s32.totalorder %s133_s12, %s133_s12 }
  0x2a   :  { %151 = vmatpush3.bf16.msra.mxu0 %v60_v4  ;;  %v55_v9 = vpack.c.bf16 %v54_v8, %v53_v7  ;;  %p210_p2 = scmp.ne.s32.totalorder %s133_s12, %s209_s13  ;;  %p215_p4 = scmp.lt.s32.totalorder %s209_s13, %s209_s13 }
  0x2b   :  { %152 = vmatprep.subr.bf16.mxu0 %v241_v0 }
  0x2c   :  { %p216_p5 = por %p215_p4, %p214_p3 }
  0x2e   :  { %153 = vmatpush3.bf16.msra.mxu0 %v61_v6  ;;  %v51_v10 = vld [vmem:[#allocation2] sm:$0xff]  ;;  %v52_v12 = vld [vmem:[#allocation2 + $0x8] sm:$0xff]  ;;  %p217_p6 = pnand %p216_p5, %p210_p2 }
  0x31   :  { %155 = vmatmul.mubr.msk.bf16.vlgmr.msra.gmra.mrb[0].mxu0 %vm48_vm0, %v55_v9 }
 0x104   :  { %v100_v11 = vpop.f32.mrb[0].mxu0 }
 0x105   :  { %v107_v13 = vadd.f32 %v100_v11, %v51_v10  ;;  %v156_v14 = vpop.f32.mrb[1].mxu0 }
 0x106   :  { %v103_v15 = vpop.f32.mrb[2].mxu0 }
 0x107   :  { %109 = vst.msk [vmem:[#allocation2] sm:$0xff] %vm48_vm0, %v107_v13  ;;  %v108_v16 = vadd.f32 %v103_v15, %v52_v12  ;;  %v157_v17 = vpop.f32.mrb[3].mxu0 }
 0x109   :  { %110 = vst.msk [vmem:[#allocation2 + $0x8] sm:$0xff] %vm48_vm0, %v108_v16 }
 0x10e   :  { %v114_v19 = vld [vmem:[#allocation2] sm:$0xff] }
 0x10f   :  { %v123_v20 = vadd.f32 %v146_v18, %v114_v19 }
 0x110   :  { %v115_v21 = vld [vmem:[#allocation2 + $0x8] sm:$0xff] }
 0x111   :  { %v124_v22 = vadd.f32 %v146_v18, %v115_v21  ;;  %125 = vst.msk [vmem:[#allocation8] sm:$0xff] %vm48_vm0, %v123_v20 }
 0x113   :  { %126 = vst.msk [vmem:[#allocation8 + $0x8] sm:$0xff] %vm48_vm0, %v124_v22 }
 0x114   :  { %220 = shalt.err (!%p217_p6)
}
 0x115   :  { %s221_s15 = scalar_lea.hbm %s322_s3, 256 }
 0x116   :  { %p222_p7 = scmp.ne.s32.totalorder %s322_s3, %s221_s15  ;;  %p225_p8 = scmp.lt.u32.totalorder %s221_s15, %s322_s3 }
 0x118   :  { %p227_p9 = pnand %p225_p8, %p222_p7 }
 0x11a   :  { %230 = shalt.err (!%p227_p9)
}
 0x11b   :  { %138 = dma.vmem_to_hbm [thread:$0]  %s133_s12, 256, %s322_s3, [#allocation5], %s238_s22, %s238_s22, %s239_s23  }
 0x11c   :  { %235 = dma.done.wait [#allocation5], 256  }
 0x11d   :  { %236 = vsyncadd [#allocation5], 4294967040 }
 0x11e   :  { %142 = vsyncpa [#allocation4], 1 }
 0x11f   :  { %143 = vsyncpa [#allocation7], 1 }
 0x120   :  { %144 = vsyncpa [#allocation5], 1 }

</bundles_post_ra>
